<compile_context>
chip_gen: v7x
topology: tpu7x:2x2x1
jax: 0.10.0
libtpu: 0.0.40
codegen_flags: <defaults>
</compile_context>

<pallas_src>
import jax
import jax.numpy as jnp
from jax.experimental import pallas as pl
from jax.experimental.pallas import tpu as pltpu

# ---- small synthetic config -------------------------------------------------
B = 2          # batch
S = 8          # max_seq_len
H = 32         # embed_dim / hidden_size
NH = 4         # num_attention_heads
HD = H // NH   # attention head size
P = 3          # polarities_dim
ETA = 0.4      # opt.eta (>= 0 branch)
VOCAB = 64     # synthetic vocab for the stand-in "bert" embedding
LANES = 128    # lane-dense padding width
BS = B * S

# aux-slab row layout (all sub-blocks start at lane 0; sublane offsets 8-aligned)
ROW_E0 = 0          # rows [0:H),    lanes [0:NH): head-selector E * 1/sqrt(HD)
ROW_ET = H          # rows [H:H+NH), lanes [0:H) : head-selector transpose E^T
ROW_BFUSED = 40     # lanes [0:H)   : fused (window_3h ∘ linear) bias
ROW_BKVQP = 41      # lanes [0:4H)  : [bk | bv | bq | bpool]
ROW_BD = 42         # lanes [0:LANES): classifier bias (lane-padded)
AUX_ROWS = 48


def bert_spc_kernel(feats_ref, wwin_ref, wbig_ref, aux_ref, out_ref):
    """Single no-grid invocation over the whole (tiny) batch.

    feats_ref : (BS+B, 3H)  rows 0..BS-1 = concat[l|c|r] for every token,
                            rows BS..BS+B-1 = the B token-0 rows (duplicated so Q
                            is computed only for rows that reach the pooler)
    wwin_ref  : (3H, H)     (window_3h ∘ linear) fused weight, eta folded in
    wbig_ref  : (H, 2*LANES) lanes [0:4H)=[Wk|Wv|Wq|Wpool]; lanes [LANES:)=classifier (lane-padded)
    aux_ref   : (AUX_ROWS, LANES) head-selector constants + all biases (ROW_* layout)
    out_ref   : (B, LANES)  lane-padded logits; caller slices [:, :P]
    """
    # Fused window_3h + linear: ONE K=3H matmul over all BS+B rows.
    x_all = (jnp.dot(feats_ref[...], wwin_ref[...], preferred_element_type=jnp.float32)
             + aux_ref[ROW_BFUSED:ROW_BFUSED + 1, 0:H])            # (BS+B, H)
    x = x_all[0:BS]                                                # (BS, H) all tokens
    x0 = x_all[BS:BS + B]                                          # (B, H)  token-0 rows

    # TODO(synk): nn.Dropout is identity at inference time; no kernel work needed.

    w = wbig_ref[...]                                              # (H, 2*LANES)
    b_kvqp = aux_ref[ROW_BKVQP:ROW_BKVQP + 1, :]                   # (1, LANES) [bk|bv|bq|bp]

    # K,V for every token (one matmul, K at lane 0); Q only for the B token-0 rows.
    kv = (jnp.dot(x, w[:, 0:2 * H], preferred_element_type=jnp.float32)
          + b_kvqp[:, 0:2 * H])                                    # (BS, 2H)
    q0 = (jnp.dot(x0, w[:, 2 * H:3 * H], preferred_element_type=jnp.float32)
          + b_kvqp[:, 2 * H:3 * H])                                # (B, H)

    # Precomputed head-selector constants (scale folded into e_sel).
    e_sel = aux_ref[ROW_E0:ROW_E0 + H, 0:NH]                       # (H, NH)
    e_sel_t = aux_ref[ROW_ET:ROW_ET + NH, 0:H]                     # (NH, H)

    # One BertSelfAttention (zero mask) + tanh, vectorized over the batch and
    # restricted to the token-0 query (only row 0 reaches BertPooler).
    k3 = kv[:, 0:H].reshape(B, S, H)
    v3 = kv[:, H:2 * H].reshape(B, S, H)
    qk = (k3 * q0[:, None, :]).reshape(BS, H)                      # broadcast q0 over the S keys
    scores = jnp.dot(qk, e_sel,
                     preferred_element_type=jnp.float32).reshape(B, S, NH)
    m = jnp.max(scores, axis=1, keepdims=True)                     # (B, 1, NH)
    e = jnp.exp(scores - m)
    probs = e * pl.reciprocal(jnp.sum(e, axis=1, keepdims=True), approx=True)
    pe = jnp.dot(probs.reshape(BS, NH), e_sel_t,
                 preferred_element_type=jnp.float32).reshape(B, S, H)
    ctx = jnp.sum(pe * v3, axis=1)                                 # (B, H)
    enc0 = jnp.tanh(ctx)                                           # encoder output @ token 0

    # BertPooler: dense(H->H) + tanh on the first token.
    pooled = jnp.tanh(jnp.dot(enc0, w[:, 3 * H:4 * H], preferred_element_type=jnp.float32)
                      + b_kvqp[:, 3 * H:4 * H])

    # Classifier head; lane-padded weight gives a dense (B, LANES) store.
    out_ref[...] = (jnp.dot(pooled, w[:, LANES:], preferred_element_type=jnp.float32)
                    + aux_ref[ROW_BD:ROW_BD + 1, :])


def pack_params(params):
    """One-time parameter fusion/packing (construction time, not per call)."""
    assert 4 * H <= LANES, "K|V|Q|Pool packing assumes 4*H <= 128 lanes"
    assert P <= LANES, "classifier lane-padding assumes P <= 128"
    assert H + NH <= ROW_BFUSED, "head-selector rows must not overlap bias rows"

    wlin = params['wlin']
    # eta folded into the stacked window weight; then fused with self.linear.
    wwin = jnp.concatenate(
        [ETA * params['w3l'], params['w3c'], (1.0 - ETA) * params['w3r']], axis=0) @ wlin
    b_fused = params['b3'] @ wlin + params['blin']                               # (1, H)

    wbig = jnp.zeros((H, 2 * LANES), jnp.float32)
    wbig = wbig.at[:, 0:H].set(params['wk'])
    wbig = wbig.at[:, H:2 * H].set(params['wv'])
    wbig = wbig.at[:, 2 * H:3 * H].set(params['wq'])
    wbig = wbig.at[:, 3 * H:4 * H].set(params['wp'])
    wbig = wbig.at[:, LANES:LANES + P].set(params['wd'])

    # Head-selector constants, hoisted out of the kernel.
    d_head = jnp.arange(H)[:, None] // HD
    h_id = jnp.arange(NH)[None, :]
    e_sel = (d_head == h_id).astype(jnp.float32) / jnp.sqrt(jnp.float32(HD))    # (H, NH)
    e_sel_t = (d_head == h_id).astype(jnp.float32).T                            # (NH, H)

    aux = jnp.zeros((AUX_ROWS, LANES), jnp.float32)
    aux = aux.at[ROW_E0:ROW_E0 + H, 0:NH].set(e_sel)
    aux = aux.at[ROW_ET:ROW_ET + NH, 0:H].set(e_sel_t)
    aux = aux.at[ROW_BFUSED, 0:H].set(b_fused[0])
    b_kvqp = jnp.concatenate(
        [params['bk'], params['bv'], params['bq'], params['bp']], axis=1)       # (1, 4H)
    aux = aux.at[ROW_BKVQP, 0:4 * H].set(b_kvqp[0])
    aux = aux.at[ROW_BD, 0:P].set(params['bd'][0])

    return {'wwin': wwin, 'wbig': wbig, 'aux': aux}


@jax.jit
def bert_spc_forward(l_feat, c_feat, r_feat, packed):
    # Layout plumbing only: concat windows along the feature dim (eta lives in the
    # fused weight), flatten (B,S,3H)->(B*S,3H), and append the B token-0 rows so
    # the kernel computes Q only where it is needed.
    cat = jnp.concatenate([l_feat, c_feat, r_feat], axis=-1)                    # (B, S, 3H)
    feats = jnp.concatenate([cat.reshape(BS, 3 * H), cat[:, 0, :]], axis=0)     # (BS+B, 3H)

    vmem = pltpu.MemorySpace.VMEM
    out_pad = pl.pallas_call(
        bert_spc_kernel,
        out_shape=jax.ShapeDtypeStruct((B, LANES), jnp.float32),
        in_specs=[pl.BlockSpec(memory_space=vmem) for _ in range(4)],
        out_specs=pl.BlockSpec(memory_space=vmem),
        # TODO(synk): at realistic batch sizes add a row grid with
        # dimension_semantics=("parallel",) so v7x's 2 TensorCores share the work;
        # at B=2 the per-grid-step overhead would dominate.
    )(feats, packed['wwin'], packed['wbig'], packed['aux'])
    return out_pad[:, :P]


def reference_forward(l, c, r, params):
    """Pure-JAX reference mirroring the PyTorch forward (full attention)."""
    cat = jnp.concatenate([ETA * l, c, (1.0 - ETA) * r], axis=-1)                # (B,S,3H)
    w3 = jnp.concatenate([params['w3l'], params['w3c'], params['w3r']], 0)       # (3H,H)
    x = cat @ w3 + params['b3']
    x = x @ params['wlin'] + params['blin']
    q = x @ params['wq'] + params['bq']
    k = x @ params['wk'] + params['bk']
    v = x @ params['wv'] + params['bv']

    def split_heads(t):
        return t.reshape(B, S, NH, HD).transpose(0, 2, 1, 3)                     # (B,NH,S,HD)

    qh, kh, vh = split_heads(q), split_heads(k), split_heads(v)
    scores = jnp.einsum('bhqd,bhkd->bhqk', qh, kh) / jnp.sqrt(jnp.float32(HD))
    probs = jax.nn.softmax(scores, axis=-1)
    ctx = jnp.einsum('bhqk,bhkd->bhqd', probs, vh)                               # (B,NH,S,HD)
    ctx = ctx.transpose(0, 2, 1, 3).reshape(B, S, H)
    x = jnp.tanh(ctx)
    pooled = jnp.tanh(x[:, 0, :] @ params['wp'] + params['bp'])
    return pooled @ params['wd'] + params['bd']


def make_params(key):
    keys = jax.random.split(key, 16)
    scale = 0.05
    p = {}
    p['w3l'] = scale * jax.random.normal(keys[0], (H, H), jnp.float32)
    p['w3c'] = scale * jax.random.normal(keys[1], (H, H), jnp.float32)
    p['w3r'] = scale * jax.random.normal(keys[2], (H, H), jnp.float32)
    p['b3'] = scale * jax.random.normal(keys[3], (1, H), jnp.float32)
    p['wlin'] = scale * jax.random.normal(keys[4], (H, H), jnp.float32)
    p['blin'] = scale * jax.random.normal(keys[5], (1, H), jnp.float32)
    p['wq'] = scale * jax.random.normal(keys[6], (H, H), jnp.float32)
    p['bq'] = scale * jax.random.normal(keys[7], (1, H), jnp.float32)
    p['wk'] = scale * jax.random.normal(keys[8], (H, H), jnp.float32)
    p['bk'] = scale * jax.random.normal(keys[9], (1, H), jnp.float32)
    p['wv'] = scale * jax.random.normal(keys[10], (H, H), jnp.float32)
    p['bv'] = scale * jax.random.normal(keys[11], (1, H), jnp.float32)
    p['wp'] = scale * jax.random.normal(keys[12], (H, H), jnp.float32)
    p['bp'] = scale * jax.random.normal(keys[13], (1, H), jnp.float32)
    p['wd'] = scale * jax.random.normal(keys[14], (H, P), jnp.float32)
    p['bd'] = scale * jax.random.normal(keys[15], (1, P), jnp.float32)
    return p


if __name__ == "__main__":
    key = jax.random.PRNGKey(0)
    k_idx, k_emb, k_par = jax.random.split(key, 3)

    # Synthetic token index inputs (the module's declared inputs).
    text_bert_indices = jax.random.randint(k_idx, (B, S), 0, VOCAB)
    left_text_bert_indices = jax.random.randint(jax.random.fold_in(k_idx, 1), (B, S), 0, VOCAB)
    right_text_bert_indices = jax.random.randint(jax.random.fold_in(k_idx, 2), (B, S), 0, VOCAB)

    # Stand-in deterministic "bert": embedding lookup -> last_hidden_state.
    embed_table = 0.1 * jax.random.normal(k_emb, (VOCAB, H), jnp.float32)
    c_feat = embed_table[text_bert_indices]        # (B, S, H)
    l_feat = embed_table[left_text_bert_indices]   # (B, S, H)
    r_feat = embed_table[right_text_bert_indices]  # (B, S, H)

    params = make_params(k_par)
    packed = pack_params(params)                   # one-time fusion/packing

    logits = bert_spc_forward(l_feat, c_feat, r_feat, packed)
    logits = jax.block_until_ready(logits)

    ref = reference_forward(l_feat, c_feat, r_feat, params)
    assert logits.shape == (B, P)
    # Tolerance loosened slightly vs. the exact-reciprocal version to cover the
    # approx (EUP) reciprocal in the softmax denominator (~2^-12 relative error).
    assert jnp.allclose(logits, ref, atol=5e-4, rtol=5e-4), (logits, ref)

    print("KERNEL_OK")
</pallas_src>

<mosaic_0001>
module attributes {stable_mosaic.version = 11 : i64} {
  func.func @bert_spc_kernel(%arg0: memref<18x96xf32, #tpu.memory_space<vmem>>, %arg1: memref<96x32xf32, #tpu.memory_space<vmem>>, %arg2: memref<32x256xf32, #tpu.memory_space<vmem>>, %arg3: memref<48x128xf32, #tpu.memory_space<vmem>>, %arg4: memref<2x128xf32, #tpu.memory_space<vmem>>) attributes {dimension_semantics = [], scalar_prefetch = 0 : i64, scratch_operands = 0 : i64, tpu.core_type = #tpu.core_type<tc>} {
    %c0 = arith.constant 0 : index
    %c0_0 = arith.constant 0 : index
    %0 = vector.load %arg0[%c0, %c0_0] : memref<18x96xf32, #tpu.memory_space<vmem>>, vector<18x96xf32>
    %c0_1 = arith.constant 0 : index
    %c0_2 = arith.constant 0 : index
    %1 = vector.load %arg1[%c0_1, %c0_2] : memref<96x32xf32, #tpu.memory_space<vmem>>, vector<96x32xf32>
    %cst = arith.constant dense<0.000000e+00> : vector<18x32xf32>
    %2 = tpu.matmul %0, %1, %cst {dimension_numbers = #tpu.dot_dimension_numbers<[1], [0], [0], [1], [0, 0, 1, 1], [], []>} : vector<18x96xf32>, vector<96x32xf32>, vector<18x32xf32> -> vector<18x32xf32>
    %c40 = arith.constant 40 : index
    %c0_3 = arith.constant 0 : index
    %3 = vector.load %arg3[%c40, %c0_3] : memref<48x128xf32, #tpu.memory_space<vmem>>, vector<1x32xf32>
    %4 = vector.broadcast %3 : vector<1x32xf32> to vector<18x32xf32>
    %5 = arith.addf %2, %4 : vector<18x32xf32>
    %6 = vector.extract_strided_slice %5 {offsets = [0, 0], sizes = [16, 32], strides = [1, 1]} : vector<18x32xf32> to vector<16x32xf32>
    %7 = vector.extract_strided_slice %5 {offsets = [16, 0], sizes = [2, 32], strides = [1, 1]} : vector<18x32xf32> to vector<2x32xf32>
    %c0_4 = arith.constant 0 : index
    %c0_5 = arith.constant 0 : index
    %8 = vector.load %arg2[%c0_4, %c0_5] : memref<32x256xf32, #tpu.memory_space<vmem>>, vector<32x256xf32>
    %c41 = arith.constant 41 : index
    %c0_6 = arith.constant 0 : index
    %9 = vector.load %arg3[%c41, %c0_6] : memref<48x128xf32, #tpu.memory_space<vmem>>, vector<1x128xf32>
    %10 = vector.extract_strided_slice %8 {offsets = [0, 0], sizes = [32, 64], strides = [1, 1]} : vector<32x256xf32> to vector<32x64xf32>
    %cst_7 = arith.constant dense<0.000000e+00> : vector<16x64xf32>
    %11 = tpu.matmul %6, %10, %cst_7 {dimension_numbers = #tpu.dot_dimension_numbers<[1], [0], [0], [1], [0, 0, 1, 1], [], []>} : vector<16x32xf32>, vector<32x64xf32>, vector<16x64xf32> -> vector<16x64xf32>
    %12 = vector.extract_strided_slice %9 {offsets = [0, 0], sizes = [1, 64], strides = [1, 1]} : vector<1x128xf32> to vector<1x64xf32>
    %13 = vector.broadcast %12 : vector<1x64xf32> to vector<16x64xf32>
    %14 = arith.addf %11, %13 : vector<16x64xf32>
    %15 = vector.extract_strided_slice %8 {offsets = [0, 64], sizes = [32, 32], strides = [1, 1]} : vector<32x256xf32> to vector<32x32xf32>
    %cst_8 = arith.constant dense<0.000000e+00> : vector<2x32xf32>
    %16 = tpu.matmul %7, %15, %cst_8 {dimension_numbers = #tpu.dot_dimension_numbers<[1], [0], [0], [1], [0, 0, 1, 1], [], []>} : vector<2x32xf32>, vector<32x32xf32>, vector<2x32xf32> -> vector<2x32xf32>
    %17 = vector.extract_strided_slice %9 {offsets = [0, 64], sizes = [1, 32], strides = [1, 1]} : vector<1x128xf32> to vector<1x32xf32>
    %18 = vector.broadcast %17 : vector<1x32xf32> to vector<2x32xf32>
    %19 = arith.addf %16, %18 : vector<2x32xf32>
    %c0_9 = arith.constant 0 : index
    %c0_10 = arith.constant 0 : index
    %20 = vector.load %arg3[%c0_9, %c0_10] : memref<48x128xf32, #tpu.memory_space<vmem>>, vector<32x4xf32>
    %c32 = arith.constant 32 : index
    %c0_11 = arith.constant 0 : index
    %21 = vector.load %arg3[%c32, %c0_11] : memref<48x128xf32, #tpu.memory_space<vmem>>, vector<4x32xf32>
    %22 = vector.extract_strided_slice %14 {offsets = [0, 0], sizes = [16, 32], strides = [1, 1]} : vector<16x64xf32> to vector<16x32xf32>
    %23 = vector.shape_cast %22 : vector<16x32xf32> to vector<2x8x32xf32>
    %24 = vector.extract_strided_slice %14 {offsets = [0, 32], sizes = [16, 32], strides = [1, 1]} : vector<16x64xf32> to vector<16x32xf32>
    %25 = vector.shape_cast %24 : vector<16x32xf32> to vector<2x8x32xf32>
    %26 = vector.shape_cast %19 : vector<2x32xf32> to vector<2x1x32xf32>
    %27 = vector.broadcast %26 : vector<2x1x32xf32> to vector<2x8x32xf32>
    %28 = arith.mulf %23, %27 : vector<2x8x32xf32>
    %29 = vector.shape_cast %28 : vector<2x8x32xf32> to vector<16x32xf32>
    %cst_12 = arith.constant dense<0.000000e+00> : vector<16x4xf32>
    %30 = tpu.matmul %29, %20, %cst_12 {dimension_numbers = #tpu.dot_dimension_numbers<[1], [0], [0], [1], [0, 0, 1, 1], [], []>} : vector<16x32xf32>, vector<32x4xf32>, vector<16x4xf32> -> vector<16x4xf32>
    %31 = vector.shape_cast %30 : vector<16x4xf32> to vector<2x8x4xf32>
    %cst_13 = arith.constant dense<0xFF800000> : vector<2x4xf32>
    %32 = vector.multi_reduction <maximumf>, %31, %cst_13 [1] : vector<2x8x4xf32> to vector<2x4xf32>
    %33 = vector.shape_cast %32 : vector<2x4xf32> to vector<2x1x4xf32>
    %34 = vector.broadcast %33 : vector<2x1x4xf32> to vector<2x8x4xf32>
    %35 = arith.subf %31, %34 : vector<2x8x4xf32>
    %36 = math.exp %35 : vector<2x8x4xf32>
    %cst_14 = arith.constant dense<0.000000e+00> : vector<2x4xf32>
    %37 = vector.multi_reduction <add>, %36, %cst_14 [1] : vector<2x8x4xf32> to vector<2x4xf32>
    %38 = vector.shape_cast %37 : vector<2x4xf32> to vector<2x1x4xf32>
    %39 = tpu.reciprocal %38 {approx = true} : vector<2x1x4xf32> -> vector<2x1x4xf32>
    %40 = vector.broadcast %39 : vector<2x1x4xf32> to vector<2x8x4xf32>
    %41 = arith.mulf %36, %40 : vector<2x8x4xf32>
    %42 = vector.shape_cast %41 : vector<2x8x4xf32> to vector<16x4xf32>
    %cst_15 = arith.constant dense<0.000000e+00> : vector<16x32xf32>
    %43 = tpu.matmul %42, %21, %cst_15 {dimension_numbers = #tpu.dot_dimension_numbers<[1], [0], [0], [1], [0, 0, 1, 1], [], []>} : vector<16x4xf32>, vector<4x32xf32>, vector<16x32xf32> -> vector<16x32xf32>
    %44 = vector.shape_cast %43 : vector<16x32xf32> to vector<2x8x32xf32>
    %45 = arith.mulf %44, %25 : vector<2x8x32xf32>
    %cst_16 = arith.constant dense<0.000000e+00> : vector<2x32xf32>
    %46 = vector.multi_reduction <add>, %45, %cst_16 [1] : vector<2x8x32xf32> to vector<2x32xf32>
    %47 = math.tanh %46 : vector<2x32xf32>
    %48 = vector.extract_strided_slice %8 {offsets = [0, 96], sizes = [32, 32], strides = [1, 1]} : vector<32x256xf32> to vector<32x32xf32>
    %cst_17 = arith.constant dense<0.000000e+00> : vector<2x32xf32>
    %49 = tpu.matmul %47, %48, %cst_17 {dimension_numbers = #tpu.dot_dimension_numbers<[1], [0], [0], [1], [0, 0, 1, 1], [], []>} : vector<2x32xf32>, vector<32x32xf32>, vector<2x32xf32> -> vector<2x32xf32>
    %50 = vector.extract_strided_slice %9 {offsets = [0, 96], sizes = [1, 32], strides = [1, 1]} : vector<1x128xf32> to vector<1x32xf32>
    %51 = vector.broadcast %50 : vector<1x32xf32> to vector<2x32xf32>
    %52 = arith.addf %49, %51 : vector<2x32xf32>
    %53 = math.tanh %52 : vector<2x32xf32>
    %54 = vector.extract_strided_slice %8 {offsets = [0, 128], sizes = [32, 128], strides = [1, 1]} : vector<32x256xf32> to vector<32x128xf32>
    %cst_18 = arith.constant dense<0.000000e+00> : vector<2x128xf32>
    %55 = tpu.matmul %53, %54, %cst_18 {dimension_numbers = #tpu.dot_dimension_numbers<[1], [0], [0], [1], [0, 0, 1, 1], [], []>} : vector<2x32xf32>, vector<32x128xf32>, vector<2x128xf32> -> vector<2x128xf32>
    %c42 = arith.constant 42 : index
    %c0_19 = arith.constant 0 : index
    %56 = vector.load %arg3[%c42, %c0_19] : memref<48x128xf32, #tpu.memory_space<vmem>>, vector<1x128xf32>
    %57 = vector.broadcast %56 : vector<1x128xf32> to vector<2x128xf32>
    %58 = arith.addf %55, %57 : vector<2x128xf32>
    %c0_20 = arith.constant 0 : index
    %c0_21 = arith.constant 0 : index
    %59 = vector.load %arg4[%c0_20, %c0_21] : memref<2x128xf32, #tpu.memory_space<vmem>>, vector<2x128xf32>
    tpu.vector_store %arg4[%c0_20, %c0_21], %58 {strides = array<i32>} : memref<2x128xf32, #tpu.memory_space<vmem>>, vector<2x128xf32>,
    return
  }
}

</mosaic_0001>

<bundles_post_ra>
// kernel: bert_spc_forward.1
= control target key start
LH: loop header
LB: loop body
LE: loop exit
PB: predicated region body
PF: predicated region fallthrough
CT: control target
= control target key end

     0   :  { %v1044_v3 = vmov 0.0|0.0   ;;  %vm1045_vm0 = vmmov 0   ;;  %v1046_v6 = vmov 0.0   ;;  %s1238_s0 = inlined_call_operand.vmem [shape: f32[18,96], index: 0, kind: input, shape index: {}]   ;;  %s1239_s1 = inlined_call_operand.vmem [shape: f32[96,32], index: 1, kind: input, shape index: {}]   ;;  %s1240_s2 = inlined_call_operand.vmem [shape: f32[32,256], index: 2, kind: input, shape index: {}]   ;;  %s1241_s3 = inlined_call_operand.vmem [shape: f32[48,128], index: 3, kind: input, shape index: {}]   ;;  %s1242_s4 = inlined_call_operand.hbm [shape: f32[2,128], index: 4, kind: output, shape index: {}]  }
   0x1   :  { %v21_v0 = vld [vmem:[%s1239_s1] sm:$0xff]  ;;  %v22_v1 = vld [vmem:[%s1239_s1 + $0x8] sm:$0xff]  ;;  %v23_v2 = vld [vmem:[%s1239_s1 + $0x10] sm:$0xff]  ;;  %926 = vmatprep.subr.bf16.mxu0 %v1044_v3  ;;  %857 = vmatprep.mubr.msk.f32.mxu0 %vm1045_vm0, %v1046_v6 }
   0x2   :  { %v927_v4 = vpack.c.bf16 %v22_v1, %v21_v0  ;;  %v24_v5 = vld [vmem:[%s1239_s1 + $0x18] sm:$0xff]  ;;  %v25_v8 = vld [vmem:[%s1239_s1 + $0x20] sm:$0xff]  ;;  %v26_v9 = vld [vmem:[%s1239_s1 + $0x28] sm:$0xff] }
   0x3   :  { %v930_v7 = vpack.c.bf16 %v24_v5, %v23_v2  ;;  %v128_v10 = vld [vmem:[%s1240_s2] sm:$0xff]  ;;  %v130_v11 = vld [vmem:[%s1240_s2 + $0x10] sm:$0xff] }
   0x4   :  { %928 = vmatpush3.bf16.msra.mxu0 %v927_v4  ;;  %v132_v12 = vld [vmem:[%s1240_s2 + $0x20] sm:$0xff]  ;;  %v1108_v13 = vpack.i.bf16 %v130_v11, %v128_v10  ;;  %v134_v14 = vld [vmem:[%s1240_s2 + $0x30] sm:$0xff]  ;;  %v944_v15 = vpack.c.bf16 %v130_v11, %v128_v10 }
   0x5   :  { %929 = vmatprep.subr.bf16.mxu0 %v1044_v3 }
   0x6   :  { %9 = vsyncpa [#allocation3], 0  ;;  %v933_v16 = vpack.c.bf16 %v26_v9, %v25_v8  ;;  %v27_v17 = vld [vmem:[%s1239_s1 + $0x30] sm:$0xff]  ;;  %v28_v18 = vld [vmem:[%s1239_s1 + $0x38] sm:$0xff]  ;;  %s1047_s13 = smov 64   ;;  %v1122_v19 = vpack.i.bf16 %v134_v14, %v132_v12  ;;  %945 = vmatprep.subr.bf16.mxu1 %v944_v15  ;;  %vm38_vm1 = vcmask 785408   ;;  %v948_v30 = vpack.c.bf16 %v134_v14, %v132_v12 }
   0x7   :  { %987 = vrot.lane.b32.xlu0 %v1108_v13, %s1047_s13  ;;  %947 = vmatpush3.bf16.msra.mxu1 %v944_v15  ;;  %v936_v20 = vpack.c.bf16 %v28_v18, %v27_v17  ;;  %v29_v21 = vld [vmem:[%s1239_s1 + $0x40] sm:$0xff]  ;;  %v30_v22 = vld [vmem:[%s1239_s1 + $0x48] sm:$0xff]  ;;  %v31_v24 = vld [vmem:[%s1239_s1 + $0x50] sm:$0xff]  ;;  %vm141_vm2 = vcmask 261120   ;;  %v1048_v56 = vmov 1966171168   ;;  %v325_v58 = vlaneseq }
   0x8   :  { %931 = vmatpush3.bf16.msra.mxu0 %v930_v7  ;;  %v939_v23 = vpack.c.bf16 %v30_v22, %v29_v21  ;;  %v32_v25 = vld [vmem:[%s1239_s1 + $0x58] sm:$0xff]  ;;  %v18_v27 = vld [vmem:[%s1238_s0] sm:$0xff]  ;;  %v19_v28 = vld [vmem:[%s1238_s0 + $0x8] sm:$0xff]  ;;  %949 = vmatprep.subr.bf16.mxu1 %v948_v30  ;;  %v323_v57 = vunpack.c.l.s4 %v1048_v56  ;;  %s1049_s12 = smov 96   ;;  %vm482_vm3 = vcmask 1043456   ;;  %s1050_s15 = smov 32  }
   0x9   :  { %932 = vmatprep.subr.bf16.mxu0 %v1044_v3  ;;  %v942_v26 = vpack.c.bf16 %v32_v25, %v31_v24  ;;  %v20_v29 = vld [vmem:[%s1238_s0 + $0x10] sm:$0x3]  ;;  %v1161_v31 = vld [vmem:[%s1241_s3 + $0x29] ss:$0 sm:$0xff]  ;;  %v772_v33 = vld [vmem:[%s1241_s3 + $0x28] ss:$0 sm:$0xff] }
   0xa   :  { %240 = vrot.lane.b32.xlu1 %v1161_v31, %s1047_s13  ;;  %v316_v50 = vld [vmem:[%s1241_s3] sm:$0xff]  ;;  %v317_v51 = vld [vmem:[%s1241_s3 + $0x8] sm:$0xff]  ;;  %v318_v53 = vld [vmem:[%s1241_s3 + $0x10] sm:$0xff]  ;;  %v324_v63 = vunpack.c.0.s8 %v323_v57  ;;  %v326_v0 = vshrl.u32 %v325_v58, 7  ;;  %vm437_vm4 = vcmask 31744   ;;  %vm589_vm5 = vcmask 1041409  }
   0xb   :  { %992 = vrot.lane.b32.xlu0 %v1122_v19, %s1047_s13  ;;  %951 = vmatpush3.bf16.msra.mxu1 %v948_v30  ;;  %v958_v52 = vpack.c.bf16 %v317_v51, %v316_v50  ;;  %v319_v54 = vld [vmem:[%s1241_s3 + $0x18] sm:$0xff]  ;;  %v320_v18 = vld [vmem:[%s1241_s3 + $0x20] sm:$0xf]  ;;  %s1051_s1 = smov [#allocation2]  }
   0xc   :  { %934 = vmatpush3.bf16.msra.mxu0 %v933_v16  ;;  %952 = vmatprep.subr.bf16.mxu1 %v1044_v3  ;;  %v962_v55 = vpack.c.bf16 %v319_v54, %v318_v53  ;;  %v327_v2 = vsub.s32 %v324_v63, %v326_v0  ;;  %v346_v9 = vsub.s32 0, %v326_v0  ;;  %s764_s26 = sshll.u32 %s1051_s1, 4  ;;  %s765_s26 = int_to_ptr.vmem [resolvable:$true] %s764_s26 }
   0xd   :  { %935 = vmatprep.subr.bf16.mxu0 %v1044_v3  ;;  %p1025_p1 = scmp.lt.s32.totalorder %s765_s26, %s765_s26 }
  0x10   :  { %937 = vmatpush3.bf16.msra.mxu0 %v936_v20 }
  0x11   :  { %938 = vmatprep.subr.bf16.mxu0 %v1044_v3 }
  0x14   :  { %940 = vmatpush3.bf16.msra.mxu0 %v939_v23 }
  0x15   :  { %941 = vmatprep.subr.bf16.mxu0 %v1044_v3 }
  0x18   :  { %943 = vmatpush3.bf16.msra.mxu0 %v942_v26 }
  0x19   :  { %966 = vmatprep.subr.bf16.mxu0 %v1044_v3 }
  0x1b   :  { %858 = vmatmul.mubr.msk.f32.vlgmr.msra.gmra.mrb[0].mxu0 %vm38_vm1, %v18_v27 }
  0x1c   :  { %860 = vmatprep.mubr.msk.f32.mxu0 %vm1045_vm0, %v1046_v6 }
  0x1f   :  { %861 = vmatmul.mubr.msk.f32.gmra.mrb[2].mxu0 %vm38_vm1, %v19_v28 }
  0x20   :  { %863 = vmatprep.mubr.msk.f32.mxu0 %vm1045_vm0, %v1046_v6 }
  0x23   :  { %864 = vmatmul.mubr.msk.f32.gmra.mrb[4].mxu0 %vm38_vm1, %v20_v29 }
  0x24   :  { %912 = vmatprep.mubr.msk.f32.mxu0 %vm1045_vm0, %v1046_v6 }
  0x79   :  { %v988_v32 = vpop.permute.xlu0 %987 }
  0x7a   :  { %v990_v35 = vunpack.i.h.bf16 %v988_v32  ;;  %v989_v36 = vunpack.i.l.bf16 %v988_v32 }
  0x7c   :  { %v953_v40 = vpack.c.bf16 %v990_v35, %v989_v36  ;;  %v241_v1 = vpop.permute.xlu1 %240 }
  0x7d   :  { %v993_v39 = vpop.permute.xlu0 %992 }
  0x7e   :  { %v995_v42 = vunpack.i.h.bf16 %v993_v39  ;;  %v994_v43 = vunpack.i.l.bf16 %v993_v39 }
  0x80   :  { %v956_v46 = vpack.c.bf16 %v995_v42, %v994_v43 }
  0xee   :  { %v114_v34 = vpop.f32.mrb[0].mxu0 }
  0xef   :  { %v115_v37 = vadd.f32 %v772_v33, %v114_v34  ;;  %v859_v38 = vpop.f32.mrb[1].mxu0 }
  0xf1   :  { %874 = vmatprep.mubr.msk.f32.mxu1 %vm141_vm2, %v115_v37 }
  0xf2   :  { %v119_v41 = vpop.f32.mrb[2].mxu0 }
  0xf3   :  { %v120_v44 = vadd.f32 %v772_v33, %v119_v41  ;;  %v862_v45 = vpop.f32.mrb[3].mxu0 }
  0xf5   :  { %875 = vmatmul.mubr.msk.f32.vlgmr.msra.gmra.mrb[0].mxu1 %vm141_vm2, %v120_v44 }
  0xf6   :  { %954 = vmatpush3.bf16.msra.mxu1 %v953_v40  ;;  %v124_v47 = vpop.f32.mrb[4].mxu0  ;;  %885 = vmatprep.mubr.msk.f32.mxu1 %vm1045_vm0, %v1046_v6 }
  0xf7   :  { %955 = vmatprep.subr.bf16.mxu1 %v1044_v3  ;;  %v865_v48 = vpop.f32.mrb[5].mxu0  ;;  %v125_v49 = vadd.f32 %v772_v33, %v124_v47 }
  0xfa   :  { %957 = vmatpush3.bf16.msra.mxu1 %v956_v46 }
  0xfb   :  { %959 = vmatprep.subr.bf16.mxu1 %v958_v52 }
  0xfd   :  { %886 = vmatmul.mubr.msk.f32.vlgmr.msra.gmra.mrb[2].mxu1 %vm141_vm2, %v125_v49 }
  0xfe   :  { %961 = vmatpush3.bf16.msra.mxu1 %v958_v52 }
  0xff   :  { %963 = vmatprep.subr.bf16.mxu1 %v962_v55 }
 0x102   :  { %965 = vmatpush3.bf16.msra.mxu1 %v962_v55 }
 0x103   :  { %899 = vmatprep.subr.msk.mxu1 %vm482_vm3, %v320_v18 }
 0x1c8   :  { %v876_v59 = vpop.f32.mrb[0].mxu1 }
 0x1c9   :  { %v220_v60 = vadd.f32 %v876_v59, %v1161_v31  ;;  %v214_v61 = vpop.f32.mrb[1].mxu1 }
 0x1ca   :  { %v215_v62 = vadd.f32 %v1161_v31, %v214_v61 }
 0x1cb   :  { %565 = vrot.lane.b32.xlu0 %v220_v60, %s1049_s12 }
 0x1cc   :  { %563 = vrot.lane.b32.xlu1 %v215_v62, %s1049_s12 }
 0x1cf   :  { %1002 = vrot.lane.b32.xlu0 %v1122_v19, %s1050_s15 }
 0x1d0   :  { %v312_v4 = vpop.f32.mrb[2].mxu1  ;;  %997 = vrot.lane.b32.xlu1 %v1108_v13, %s1050_s15 }
 0x1d1   :  { %v313_v5 = vadd.f32 %v312_v4, %v241_v1  ;;  %v887_v7 = vpop.f32.mrb[3].mxu1 }
 0x1d3   :  { %v328_v8 = vrot.slane %v313_v5, %v327_v2 }
 0x1d4   :  { %603 = vrot.lane.b32.xlu1 %v1161_v31, %s1050_s15 }
 0x1d5   :  { %v329_v10 = vcombine.high %v328_v8, %v328_v8  ;;  %v336_v11 = vrot.slane %v328_v8, %v327_v2 }
 0x1d7   :  { %v343_v12 = vrot.slane %v329_v10, %v327_v2  ;;  %v347_v14 = vrot.slane %v336_v11, %v346_v9 }
 0x1d9   :  { %v351_v15 = vrot.slane %v343_v12, %v346_v9  ;;  %v354_v16 = vmul.f32 %v347_v14, %v215_v62 }
 0x1db   :  { %v355_v17 = vmul.f32 %v351_v15, %v220_v60  ;;  %896 = vmatprep.mubr.msk.f32.mxu1 %vm141_vm2, %v354_v16 }
 0x1dd   :  { %897 = vmatmul.mubr.msk.f32.vlgmr.msra.gmra.mrb[4].mxu1 %vm141_vm2, %v355_v17 }
 0x1de   :  { %900 = vmatpush3.msk.msra.mxu1 %vm482_vm3, %v320_v18 }
 0x1df   :  { %972 = vmatprep.subr.bf16.mxu1 %v1044_v3 }
 0x23d   :  { %v566_v58 = vpop.permute.xlu0 %565 }
 0x23e   :  { %v564_v59 = vpop.permute.xlu1 %563 }
 0x241   :  { %v1003_v61 = vpop.permute.xlu0 %1002 }
 0x242   :  { %v998_v60 = vpop.permute.xlu1 %997  ;;  %v1005_v0 = vunpack.i.h.bf16 %v1003_v61  ;;  %v1004_v1 = vunpack.i.l.bf16 %v1003_v61 }
 0x243   :  { %v1000_v62 = vunpack.i.h.bf16 %v998_v60  ;;  %v999_v63 = vunpack.i.l.bf16 %v998_v60 }
 0x244   :  { %v970_v4 = vpack.c.bf16 %v1005_v0, %v1004_v1 }
 0x245   :  { %v967_v2 = vpack.c.bf16 %v1000_v62, %v999_v63 }
 0x247   :  { %968 = vmatpush3.bf16.msra.mxu0 %v967_v2 }
 0x248   :  { %969 = vmatprep.subr.bf16.mxu0 %v1044_v3 }
 0x24b   :  { %971 = vmatpush3.bf16.msra.mxu0 %v970_v4 }
 0x2b0   :  { %v898_v20 = vpop.f32.mrb[4].mxu1 }
 0x2b1   :  { %v445_v21 = vsel %vm437_vm4, %v898_v20, -inf  ;;  %v428_v22 = vpop.f32.mrb[5].mxu1 }
 0x2b2   :  { %v446_v23 = vrot.slane %v445_v21, 4  ;;  %v438_v24 = vsel %vm437_vm4, %v428_v22, -inf }
 0x2b3   :  { %v439_v25 = vrot.slane %v438_v24, 4 }
 0x2b4   :  { %v447_v26 = vmax.f32 %v445_v21, %v446_v23 }
 0x2b5   :  { %v440_v27 = vmax.f32 %v438_v24, %v439_v25 }
 0x2b6   :  { %v448_v28 = vrot.slane %v447_v26, 2 }
 0x2b7   :  { %v441_v29 = vrot.slane %v440_v27, 2 }
 0x2b8   :  { %v449_v30 = vmax.f32 %v447_v26, %v448_v28  ;;  %v129_v28 = vld [vmem:[%s1240_s2 + $0x8] sm:$0xff] }
 0x2b9   :  { %v442_v32 = vmax.f32 %v440_v27, %v441_v29  ;;  %v131_v29 = vld [vmem:[%s1240_s2 + $0x18] sm:$0xff] }
 0x2ba   :  { %v450_v13 = vrot.slane %v449_v30, 1 }
 0x2bb   :  { %v443_v33 = vrot.slane %v442_v32, 1 }
 0x2bc   :  { %v451_v19 = vmax.f32 %v449_v30, %v450_v13  ;;  %v133_v30 = vld [vmem:[%s1240_s2 + $0x28] sm:$0xff]  ;;  %v135_v13 = vld [vmem:[%s1240_s2 + $0x38] sm:$0xff]  ;;  %s1020_s2 = scalar_lea.vmem %s765_s26, 32 }
 0x2bd   :  { %v444_v34 = vmax.f32 %v442_v32, %v443_v33  ;;  %v973_v32 = vpack.c.bf16 %v131_v29, %v129_v28  ;;  %v976_v33 = vpack.c.bf16 %v135_v13, %v133_v30  ;;  %p1021_p0 = scmp.ne.s32.totalorder %s765_s26, %s1020_s2  ;;  %p1026_p2 = scmp.lt.s32.totalorder %s1020_s2, %s1020_s2 }
 0x2be   :  { %v453_v31 = vsub.f32 %v898_v20, %v451_v19  ;;  %v604_v19 = vpop.permute.xlu1 %603 }
 0x2bf   :  { %v452_v35 = vsub.f32 %v428_v22, %v444_v34  ;;  %p1027_p3 = por %p1026_p2, %p1025_p1 }
 0x2c0   :  { %v456_v36 = vmul.f32 1.442695, %v453_v31 }
 0x2c1   :  { %v454_v37 = vmul.f32 1.442695, %v452_v35  ;;  %p1028_p4 = pnand %p1027_p3, %p1021_p0 }
 0x2c2   :  { %1006 = vpow2.f32 %v456_v36 }
 0x2c3   :  { %1008 = vpow2.f32 %v454_v37  ;;  %v786_v37 = vld [vmem:[%s1241_s3 + $0x2a] ss:$0 sm:$0xff] }
 0x2cc   :  { %v1007_v38 = vpop.eup %1006 }
 0x2cd   :  { %v1009_v39 = vpop.eup %1008  ;;  %v465_v40 = vsel %vm437_vm4, %v1007_v38, 0.0 }
 0x2ce   :  { %v466_v41 = vrot.slane %v465_v40, 4  ;;  %v458_v42 = vsel %vm437_vm4, %v1009_v39, 0.0 }
 0x2cf   :  { %v459_v43 = vrot.slane %v458_v42, 4 }
 0x2d0   :  { %v467_v44 = vadd.f32 %v466_v41, %v465_v40 }
 0x2d1   :  { %v460_v45 = vadd.f32 %v459_v43, %v458_v42 }
 0x2d2   :  { %v468_v46 = vrot.slane %v467_v44, 2 }
 0x2d3   :  { %v461_v47 = vrot.slane %v460_v45, 2 }
 0x2d4   :  { %v469_v48 = vadd.f32 %v468_v46, %v467_v44 }
 0x2d5   :  { %v462_v49 = vadd.f32 %v461_v47, %v460_v45 }
 0x2d6   :  { %v470_v50 = vrot.slane %v469_v48, 1 }
 0x2d7   :  { %v463_v51 = vrot.slane %v462_v49, 1 }
 0x2d8   :  { %v471_v52 = vadd.f32 %v470_v50, %v469_v48 }
 0x2d9   :  { %v464_v53 = vadd.f32 %v463_v51, %v462_v49 }
 0x2da   :  { %1010 = vrcp.f32 %v471_v52 }
 0x2db   :  { %1012 = vrcp.f32 %v464_v53 }
 0x2e4   :  { %v1011_v54 = vpop.eup %1010 }
 0x2e5   :  { %v1013_v55 = vpop.eup %1012  ;;  %v475_v57 = vmul.f32 %v1011_v54, %v1007_v38 }
 0x2e6   :  { %v474_v56 = vmul.f32 %v1013_v55, %v1009_v39 }
 0x2e8   :  { %901 = vmatprep.mubr.msk.f32.mxu1 %vm437_vm4, %v474_v56 }
 0x2e9   :  { %902 = vmatmul.mubr.msk.f32.vlgmr.msra.gmra.mrb[6].mxu1 %vm437_vm4, %v475_v57 }
 0x2ea   :  { %923 = vmatprep.mubr.msk.f32.mxu1 %vm1045_vm0, %v1046_v6  ;;  %974 = vmatpush3.bf16.msra.mxu1 %v973_v32 }
 0x2eb   :  { %975 = vmatprep.subr.bf16.mxu1 %v1044_v3 }
 0x2ee   :  { %977 = vmatpush3.bf16.msra.mxu1 %v976_v33 }
 0x3bc   :  { %v903_v5 = vpop.f32.mrb[6].mxu1 }
 0x3bd   :  { %v570_v7 = vmul.f32 %v903_v5, %v566_v58  ;;  %v552_v8 = vpop.f32.mrb[7].mxu1 }
 0x3be   :  { %v569_v9 = vmul.f32 %v564_v59, %v552_v8 }
 0x3bf   :  { %v578_v6 = vsel %vm141_vm2, %v570_v7, 0.0 }
 0x3c0   :  { %v579_v10 = vrot.slane %v578_v6, 4  ;;  %v571_v11 = vsel %vm141_vm2, %v569_v9, 0.0 }
 0x3c1   :  { %v572_v12 = vrot.slane %v571_v11, 4 }
 0x3c2   :  { %v580_v14 = vadd.f32 %v579_v10, %v578_v6 }
 0x3c3   :  { %v573_v15 = vadd.f32 %v572_v12, %v571_v11 }
 0x3c4   :  { %v581_v16 = vrot.slane %v580_v14, 2 }
 0x3c5   :  { %v574_v17 = vrot.slane %v573_v15, 2 }
 0x3c6   :  { %v582_v18 = vadd.f32 %v581_v16, %v580_v14 }
 0x3c7   :  { %v575_v20 = vadd.f32 %v574_v17, %v573_v15 }
 0x3c8   :  { %v583_v21 = vrot.slane %v582_v18, 1 }
 0x3c9   :  { %v576_v22 = vrot.slane %v575_v20, 1 }
 0x3ca   :  { %v584_v23 = vadd.f32 %v583_v21, %v582_v18 }
 0x3cb   :  { %v577_v24 = vadd.f32 %v576_v22, %v575_v20 }
 0x3cc   :  { %1014 = vtanh.f32 %v584_v23 }
 0x3cd   :  { %1016 = vtanh.f32 %v577_v24 }
 0x3d6   :  { %v1015_v25 = vpop.eup %1014 }
 0x3d7   :  { %v1017_v26 = vpop.eup %1016 }
 0x3d8   :  { %v590_v27 = vsel %vm589_vm5, %v1015_v25, %v1017_v26 }
 0x3d9   :  { %913 = vmatmul.mubr.msk.f32.vlgmr.msra.gmra.mrb[6].mxu0 %vm141_vm2, %v590_v27 }
 0x4ac   :  { %v674_v34 = vpop.f32.mrb[6].mxu0 }
 0x4ad   :  { %v675_v31 = vadd.f32 %v674_v34, %v604_v19  ;;  %v914_v35 = vpop.f32.mrb[7].mxu0 }
 0x4af   :  { %1018 = vtanh.f32 %v675_v31 }
 0x4b9   :  { %v1019_v36 = vpop.eup %1018 }
 0x4ba   :  { %924 = vmatmul.mubr.msk.f32.vlgmr.msra.gmra.mrb[8].mxu1 %vm141_vm2, %v1019_v36 }
 0x58d   :  { %v753_v38 = vpop.f32.mrb[8].mxu1 }
 0x58e   :  { %v754_v39 = vadd.f32 %v786_v37, %v753_v38  ;;  %v925_v40 = vpop.f32.mrb[9].mxu1 }
 0x590   :  { %757 = vst [vmem:[#allocation2] sm:$0x3] %v754_v39 }
 0x591   :  { %1031 = shalt.err (!%p1028_p4)
}
 0x592   :  { %s1032_s29 = scalar_lea.hbm %s1242_s4, 32 }
 0x593   :  { %p1033_p5 = scmp.ne.s32.totalorder %s1242_s4, %s1032_s29  ;;  %p1036_p6 = scmp.lt.u32.totalorder %s1032_s29, %s1242_s4 }
 0x595   :  { %p1038_p7 = pnand %p1036_p6, %p1033_p5 }
 0x597   :  { %1041 = shalt.err (!%p1038_p7)
}
 0x598   :  { %767 = dma.vmem_to_hbm [thread:$0]  %s765_s26, 32, %s1242_s4, [#allocation3]  }
 0x599   :  { %1042 = dma.done.wait [#allocation3], 32  }
 0x59a   :  { %1043 = vsyncadd [#allocation3], 4294967264 }
 0x59b   :  { %771 = vsyncpa [#allocation3], 1 }

</bundles_post_ra>
